<compile_context>
chip_gen: v7x
topology: tpu7x:2x2x1
jax: 0.10.0
libtpu: 0.0.40
codegen_flags: <defaults>
</compile_context>

<pallas_src>
import jax
import jax.numpy as jnp
from jax.experimental import pallas as pl
from jax.experimental.pallas import tpu as pltpu


def _cattn_head_kernel(x_ref, w1_ref, w2_ref, b2_ref, o_ref):
    # x_ref : (Cin, TM)    channel-sublane / pixel-lane tile of the input
    # w1_ref: (Hid, Cin)   conv1 weight (PyTorch (out,in) layout, no transpose)
    # w2_ref: (Cout, Hid)  conv2 weight
    # b2_ref: (Cout, 1)    conv2 bias (broadcast along the lane/pixel axis)
    # o_ref : (Cout, TM)
    h = jnp.dot(w1_ref[...], x_ref[...], preferred_element_type=jnp.float32)
    h = jnp.maximum(h, 0.0)                                    # ReLU (f32)
    y = jnp.dot(w2_ref[...], h, preferred_element_type=jnp.float32)
    o_ref[...] = (y + b2_ref[...]).astype(o_ref.dtype)


def cattn_head_forward(x_nchw, w1, w2, b2, *, tm=2048):
    """Pallas implementation of CAttnHead.forward.

    x_nchw: (N, Cin, H, W)
    w1    : (Hid, Cin)   conv1 weight (PyTorch (out,in,1,1) with 1x1 squeezed)
    w2    : (Cout, Hid)  conv2 weight
    b2    : (Cout,)      conv2 bias
    returns (N, Cout, H, W)
    """
    N, Cin, H, W = x_nchw.shape
    Hid, _ = w1.shape
    Cout, _ = w2.shape
    M = H * W

    # Pixel tile on the lane axis: multiple of 128, large to amortize per-step
    # overhead, but never bigger than the (padded) pixel count.
    tm = min(tm, ((M + 127) // 128) * 128)
    m_pad = pl.cdiv(M, tm) * tm

    # NCHW -> (N, Cin, M): pure reshape, no HBM transpose traffic.
    x3 = x_nchw.reshape(N, Cin, M)
    if m_pad != M:
        # Pad the pixel axis to a tile multiple (zeros are harmless and are
        # sliced off after the kernel).
        x3 = jnp.pad(x3, ((0, 0), (0, 0), (0, m_pad - M)))

    b2_2d = b2.reshape(Cout, 1)

    itemsize = jnp.dtype(x_nchw.dtype).itemsize
    cost = pl.CostEstimate(
        flops=2 * N * M * (Cin * Hid + Hid * Cout),
        transcendentals=0,
        bytes_accessed=itemsize * N * M * (Cin + Cout)
        + 4 * (Hid * Cin + Cout * Hid + Cout),
    )

    out3 = pl.pallas_call(
        _cattn_head_kernel,
        out_shape=jax.ShapeDtypeStruct((N, Cout, m_pad), x_nchw.dtype),
        grid_spec=pltpu.PrefetchScalarGridSpec(
            num_scalar_prefetch=0,
            grid=(N, m_pad // tm),
            in_specs=[
                # x tile: batch dim squeezed, full channel axis, TM pixels.
                pl.BlockSpec((None, Cin, tm), lambda n, m: (n, 0, m)),
                # Grid-invariant weights / bias (constant index_map -> DMA'd once).
                pl.BlockSpec((Hid, Cin), lambda n, m: (0, 0)),
                pl.BlockSpec((Cout, Hid), lambda n, m: (0, 0)),
                pl.BlockSpec((Cout, 1), lambda n, m: (0, 0)),
            ],
            out_specs=pl.BlockSpec((None, Cout, tm), lambda n, m: (n, 0, m)),
        ),
        compiler_params=pltpu.CompilerParams(
            dimension_semantics=("parallel", "parallel")),
        cost_estimate=cost,
    )(x3, w1, w2, b2_2d)

    # (N, Cout, m_pad) -> (N, Cout, H, W): slice off padding, pure reshape.
    return out3[:, :, :M].reshape(N, Cout, H, W)


def _reference(x_nchw, w1, w2, b2):
    # Pure-JAX reference of the same math.
    N, Cin, H, W = x_nchw.shape
    Cout = w2.shape[0]
    x3 = x_nchw.reshape(N, Cin, H * W)
    h = jnp.maximum(jnp.einsum("oc,ncm->nom", w1, x3), 0.0)
    y = jnp.einsum("oh,nhm->nom", w2, h) + b2[None, :, None]
    return y.reshape(N, Cout, H, W)


if __name__ == "__main__":
    # Small shapes consistent with the module (1x1 convs over NCHW).
    # W=15 makes H*W=240 (not a multiple of 128) to exercise the padding path.
    N, Cin, H, W = 2, 32, 16, 15
    Hid, Cout = 64, 2

    key = jax.random.PRNGKey(0)
    kx, k1, k2, kb = jax.random.split(key, 4)

    x = jax.random.normal(kx, (N, Cin, H, W), dtype=jnp.float32)
    w1 = jax.random.normal(k1, (Hid, Cin), dtype=jnp.float32) * (1.0 / jnp.sqrt(Cin))
    w2 = jax.random.normal(k2, (Cout, Hid), dtype=jnp.float32) * (1.0 / jnp.sqrt(Hid))
    b2 = jax.random.normal(kb, (Cout,), dtype=jnp.float32) * 0.1

    out = cattn_head_forward(x, w1, w2, b2)
    out = jax.block_until_ready(out)

    ref = jax.block_until_ready(_reference(x, w1, w2, b2))
    assert out.shape == (N, Cout, H, W)
    assert jnp.allclose(out, ref, atol=1e-4, rtol=1e-4), "mismatch vs reference"

    print("KERNEL_OK")
</pallas_src>

<mosaic_0001>
module attributes {stable_mosaic.version = 11 : i64} {
  func.func @_cattn_head_kernel(%arg0: i32, %arg1: i32, %arg2: memref<1x32x256xf32, #tpu.memory_space<vmem>>, %arg3: memref<64x32xf32, #tpu.memory_space<vmem>>, %arg4: memref<2x64xf32, #tpu.memory_space<vmem>>, %arg5: memref<2x1xf32, #tpu.memory_space<vmem>>, %arg6: memref<1x2x256xf32, #tpu.memory_space<vmem>>) attributes {dimension_semantics = [#tpu.dimension_semantics<parallel>, #tpu.dimension_semantics<parallel>], iteration_bounds = array<i64: 2, 1>, scalar_prefetch = 0 : i64, scratch_operands = 0 : i64, tpu.core_type = #tpu.core_type<tc>, window_params = [{transform_indices = @transform_0, window_bounds = array<i64: 1, 32, 256>}, {pipeline_mode = #tpu.pipeline_mode<synchronous>, transform_indices = @transform_1, window_bounds = array<i64: 64, 32>}, {pipeline_mode = #tpu.pipeline_mode<synchronous>, transform_indices = @transform_2, window_bounds = array<i64: 2, 64>}, {pipeline_mode = #tpu.pipeline_mode<synchronous>, transform_indices = @transform_3, window_bounds = array<i64: 2, 1>}, {transform_indices = @transform_4, window_bounds = array<i64: 1, 2, 256>}]} {
    %c0 = arith.constant 0 : index
    %c0_0 = arith.constant 0 : index
    %0 = vector.load %arg3[%c0, %c0_0] : memref<64x32xf32, #tpu.memory_space<vmem>>, vector<64x32xf32>
    %c0_1 = arith.constant 0 : index
    %c0_2 = arith.constant 0 : index
    %c0_3 = arith.constant 0 : index
    %1 = vector.load %arg2[%c0_1, %c0_2, %c0_3] : memref<1x32x256xf32, #tpu.memory_space<vmem>>, vector<1x32x256xf32>
    %2 = vector.shape_cast %1 : vector<1x32x256xf32> to vector<32x256xf32>
    %cst = arith.constant dense<0.000000e+00> : vector<64x256xf32>
    %3 = tpu.matmul %0, %2, %cst {dimension_numbers = #tpu.dot_dimension_numbers<[1], [0], [0], [1], [0, 0, 1, 1], [], []>} : vector<64x32xf32>, vector<32x256xf32>, vector<64x256xf32> -> vector<64x256xf32>
    %cst_4 = arith.constant 0.000000e+00 : f32
    %4 = vector.broadcast %cst_4 : f32 to vector<64x256xf32>
    %5 = arith.maximumf %3, %4 : vector<64x256xf32>
    %c0_5 = arith.constant 0 : index
    %c0_6 = arith.constant 0 : index
    %6 = vector.load %arg4[%c0_5, %c0_6] : memref<2x64xf32, #tpu.memory_space<vmem>>, vector<2x64xf32>
    %cst_7 = arith.constant dense<0.000000e+00> : vector<2x256xf32>
    %7 = tpu.matmul %6, %5, %cst_7 {dimension_numbers = #tpu.dot_dimension_numbers<[1], [0], [0], [1], [0, 0, 1, 1], [], []>} : vector<2x64xf32>, vector<64x256xf32>, vector<2x256xf32> -> vector<2x256xf32>
    %c0_8 = arith.constant 0 : index
    %c0_9 = arith.constant 0 : index
    %8 = vector.load %arg5[%c0_8, %c0_9] : memref<2x1xf32, #tpu.memory_space<vmem>>, vector<2x1xf32>
    %9 = vector.broadcast %8 : vector<2x1xf32> to vector<2x256xf32>
    %10 = arith.addf %7, %9 : vector<2x256xf32>
    %c0_10 = arith.constant 0 : index
    %c0_11 = arith.constant 0 : index
    %c0_12 = arith.constant 0 : index
    %11 = vector.load %arg6[%c0_10, %c0_11, %c0_12] : memref<1x2x256xf32, #tpu.memory_space<vmem>>, vector<1x2x256xf32>
    %12 = vector.shape_cast %11 : vector<1x2x256xf32> to vector<2x256xf32>
    %13 = vector.shape_cast %10 : vector<2x256xf32> to vector<1x2x256xf32>
    tpu.vector_store %arg6[%c0_10, %c0_11, %c0_12], %13 {strides = array<i32>} : memref<1x2x256xf32, #tpu.memory_space<vmem>>, vector<1x2x256xf32>,
    return
  }
  func.func @transform_0(%arg0: i32, %arg1: i32) -> (i32, i32, i32) {
    %c0_i32 = arith.constant 0 : i32
    %c0_i32_0 = arith.constant 0 : i32
    return %arg0, %c0_i32, %arg1 : i32, i32, i32
  }
  func.func @transform_1(%arg0: i32, %arg1: i32) -> (i32, i32) {
    %c0_i32 = arith.constant 0 : i32
    %c0_i32_0 = arith.constant 0 : i32
    %c0_i32_1 = arith.constant 0 : i32
    return %c0_i32, %c0_i32_0 : i32, i32
  }
  func.func @transform_2(%arg0: i32, %arg1: i32) -> (i32, i32) {
    %c0_i32 = arith.constant 0 : i32
    %c0_i32_0 = arith.constant 0 : i32
    %c0_i32_1 = arith.constant 0 : i32
    return %c0_i32, %c0_i32_0 : i32, i32
  }
  func.func @transform_3(%arg0: i32, %arg1: i32) -> (i32, i32) {
    %c0_i32 = arith.constant 0 : i32
    %c0_i32_0 = arith.constant 0 : i32
    %c0_i32_1 = arith.constant 0 : i32
    return %c0_i32, %c0_i32_0 : i32, i32
  }
  func.func @transform_4(%arg0: i32, %arg1: i32) -> (i32, i32, i32) {
    %c0_i32 = arith.constant 0 : i32
    %c0_i32_0 = arith.constant 0 : i32
    return %arg0, %c0_i32, %arg1 : i32, i32, i32
  }
}

</mosaic_0001>

<bundles_post_ra>
// kernel: tpu_custom_call.1
= control target key start
LH: loop header
LB: loop body
LE: loop exit
PB: predicated region body
PF: predicated region fallthrough
CT: control target
= control target key end

     0   :  { %9 = vsyncpa [#allocation3], 0  ;;  %s1076_s0 = inlined_call_operand.hbm [shape: f32[2,32,256], index: 0, kind: input, shape index: {}]   ;;  %s1077_s1 = inlined_call_operand.vmem [shape: f32[64,32], index: 1, kind: input, shape index: {}]   ;;  %s1078_s2 = inlined_call_operand.vmem [shape: f32[2,64], index: 2, kind: input, shape index: {}]   ;;  %s1079_s3 = inlined_call_operand.vmem [shape: f32[2,1], index: 3, kind: input, shape index: {}]   ;;  %s1080_s4 = inlined_call_operand.hbm [shape: f32[2,2,256], index: 4, kind: output, shape index: {}]  }
   0x1   :  { %11 = vsyncpa [#allocation3 + $0x1], 0 }
   0x2   :  { %12 = vsyncpa [#allocation4], 0 }
   0x3   :  { %14 = vsyncpa [#allocation4 + $0x1], 0  ;;  %s864_s15 = smov 0   ;;  %s866_s16 = smov 0  }
   0x4   :  { %s868_s17 = smov 0   ;;  %s870_s18 = smov 0  }
   0x5   :  { %s872_s19 = smov 0   ;;  %s874_s20 = smov 0  }
   0x6 LB: > { %s601_s21 = sadd.s32 4294967295, %s831_s20   ;;  %s602_s22 = sadd.s32 4294967294, %s831_s20   ;;  %s831_s20 = sphi %s874_s20, %s20_s20   ;;  %s827_s19 = sphi %s872_s19, %s1095_s19   ;;  %s823_s18 = sphi %s870_s18, %s1094_s18   ;;  %s819_s17 = sphi %s868_s17, %s1093_s17   ;;  %s815_s16 = sphi %s866_s16, %s1092_s16   ;;  %s811_s15 = sphi %s864_s15, %s1091_s15  }
   0x7   : > { %s32_s23 = sadd.s32 1, %s827_s19  ;;  %s41_s24 = sadd.s32 1, %s819_s17 }
   0x8   : > { %p34_p0 = scmp.ge.s32.totalorder %s32_s23, 2  ;;  %p48_p1 = scmp.ne.s32.totalorder %s819_s17, %s815_s16 }
   0x9   : > { %p49_p2 = scmp.eq.s32.totalorder %s831_s20, 0  ;;  %p54_p3 = scmp.ne.s32.totalorder %s815_s16, %s811_s15 }
   0xa   : > { %s1097_s23 = smov (%p34_p0, %s32_s23), 0  ;;  %p55_p5 = scmp.eq.s32.totalorder %s601_s21, 0 }
   0xb   : > { %p905_p4 = por %p49_p2, %p48_p1  ;;  %s36_s26 = ssub.s32 %s827_s19, %s1097_s23 }
   0xc   : > { %p143_p6 = scmp.eq.s32.totalorder %s601_s21, 1  ;;  %p39_p7 = scmp.eq.s32.totalorder %s36_s26, 0 }
   0xd   : > { %p911_p8 = por %p55_p5, %p54_p3  ;;  %p149_p10 = scmp.eq.s32.totalorder %s602_s22, 1 }
   0xe   : > { %p915_p9 = por %p143_p6, %p48_p1  ;;  %p664_p13 = scmp.lt.s32.totalorder %s831_s20, 2 }
   0xf   : > { %s920_s29 = scalar_select %p39_p7, %s819_s17, %s41_s24  }
  0x10   : > { %s1084_s28 = scalar_select %p915_p9, 1, 0 }
  0x11   : > { %p922_p11 = por %p149_p10, %p54_p3  ;;  %s178_s5 = sand.u32 1, %s819_s17  }
  0x12   : > { %s605_s6 = sshll.u32 %s178_s5, 6  ;;  %s626_s7 = sshll.u32 %s827_s19, 10 }
  0x13   : > { %s1085_s30 = scalar_select %p922_p11, 1, 0 }
  0x14   : > { %s933_s10 = scalar_lea.hbm %s1076_s0, %s626_s7  ;;  %s182_s11 = scalar_lea.vmem [#allocation2], %s605_s6 }
  0x15   : > { %s191_s12 = sshll.u32 %s182_s11, 4  ;;  %p939_p0 = pnand %p664_p13, %p905_p4  ;;  %s935_s12 = int_to_ptr.vmem [resolvable:$true] %s191_s12 }
  0x16   : > { %s944_s14 = scalar_lea.sflag [#allocation3], %s178_s5  ;;  %s719_s21 = scalar_lea.hbm %s933_s10, 1024 }
  0x17   : > { %p720_p2 = scmp.ne.s32.totalorder %s933_s10, %s719_s21  ;;  %p721_p3 = pneg %p939_p0 }
  0x18   : > { %s724_s25 = scalar_lea.hbm %s1076_s0, 2048  ;;  %p725_p4 = scmp.lt.u32.totalorder %s933_s10, %s1076_s0 }
  0x19   : > { %p722_p5 = pnand %p721_p3, %p720_p2  ;;  %p726_p7 = scmp.lt.u32.totalorder %s724_s25, %s719_s21 }
  0x1a   : > { %p728_p13 = scmp.lt.u32.totalorder %s719_s21, %s933_s10 }
  0x1b   : > { %p723_p6 = pneg %p722_p5  ;;  %p727_p10 = por %p726_p7, %p725_p4 }
  0x1d   : > { %p729_p12 = por %p728_p13, %p727_p10 }
  0x1f   : > { %p730_p1 = pnand %p729_p12, %p723_p6 }
  0x21   : > { %733 = shalt.err (!%p730_p1)
}
  0x22   : > { %s734_s5 = scalar_lea.vmem %s935_s12, 1024  ;;  %s833_s7 = smov [#allocation2]  }
  0x23   : > { %p735_p2 = scmp.ne.s32.totalorder %s935_s12, %s734_s5  ;;  %s739_s8 = sshll.u32 %s833_s7, 4  ;;  %s740_s8 = int_to_ptr.vmem [resolvable:$false] %s739_s8 }
  0x24   : > { %s741_s9 = scalar_lea.vmem %s740_s8, 2048  ;;  %p742_p9 = scmp.lt.s32.totalorder %s935_s12, %s740_s8 }
  0x25   : > { %p737_p5 = pnand %p735_p2, %p721_p3  ;;  %p743_p4 = scmp.lt.s32.totalorder %s741_s9, %s734_s5 }
  0x27   : > { %p738_p11 = pneg %p737_p5  ;;  %p744_p7 = por %p743_p4, %p742_p9 }
  0x29   : > { %p745_p10 = pnand %p744_p7, %p738_p11 }
  0x2b   : > { %748 = shalt.err (!%p745_p10)
}
  0x2c   : > { %s834_s11 = smov 256   ;;  %s835_s21 = smov 16  }
  0x2d   : > { %659 = dma.hbm_to_vmem [thread:$0]  (!%p939_p0), %s933_s10, 1024, %s935_s12, %s944_s14, %s834_s11, %s834_s11, %s835_s21  }
  0x2e   : > { %p199_p12 = scmp.lt.s32.totalorder %s831_s20, 3  ;;  %p1087_p1 = scmp.ge.s32.totalorder %s831_s20, 1 }
  0x30   : > { %p200_p3 = pnand %p1087_p1, %p199_p12 }
  0x31   : > { %s976_s22 = sand.u32 (!%p200_p3), 1, %s815_s16  }
  0x32   : > { %203 = sbr.rel (%p200_p3) target bundleno = 549 (0x225), region = 36  ;;  %s609_s24 = sshll.u32 (!%p200_p3), %s976_s22, 6 }
  0x33   : > { %s206_s25 = scalar_lea.sflag (!%p200_p3), [#allocation3], %s976_s22  ;;  %s209_s26 = scalar_lea.vmem (!%p200_p3), [#allocation2], %s609_s24 }
  0x39   : > { %802 = dma.done.wait (%p911_p8), %s206_s25, 1024  }
  0x3a   : > { %804 = vsyncadd (%p911_p8), %s206_s25, 4294966272  ;;  %v836_v0 = vmov 0.0   ;;  %v245_v1 = vld [vmem:[%s209_s26 + $0x8] sm:$0xff]  ;;  %v247_v2 = vld [vmem:[%s209_s26 + $0x18] sm:$0xff]  ;;  %vm252_vm0 = vcmask 261120   ;;  %v837_v22 = vmov 0  }
  0x3b   : > { %341 = vmatprep.mubr.f32.mxu0 %v836_v0  ;;  %481 = vmatprep.mubr.f32.mxu1 %v836_v0  ;;  %v244_v3 = vld [vmem:[%s209_s26] sm:$0xff]  ;;  %v628_v4 = vpack.c.bf16 %v247_v2, %v245_v1  ;;  %v246_v5 = vld [vmem:[%s209_s26 + $0x10] sm:$0xff]  ;;  %v249_v6 = vld [vmem:[%s209_s26 + $0x28] sm:$0xff]  ;;  %vm413_vm1 = vcmask 523264   ;;  %s610_s6 = sshll.u32 %s976_s22, 2  ;;  %s627_s5 = sshll.u32 %s823_s18, 6 }
  0x3c   : > { %v251_v7 = vld [vmem:[%s209_s26 + $0x38] sm:$0xff]  ;;  %v630_v8 = vpack.c.bf16 %v246_v5, %v244_v3  ;;  %v248_v10 = vld [vmem:[%s209_s26 + $0x20] sm:$0xff]  ;;  %v250_v11 = vld [vmem:[%s209_s26 + $0x30] sm:$0xff]  ;;  %718 = vset.pattern.permute.xlu0 %v837_v22  ;;  %s233_s7 = scalar_lea.vmem [#allocation5], %s610_s6  ;;  %s1027_s21 = scalar_lea.hbm %s1080_s4, %s627_s5 }
  0x3d   : > { %v632_v9 = vpack.c.bf16 %v251_v7, %v249_v6  ;;  %629 = vmatprep.subr.bf16.mxu0 %v628_v4  ;;  %v634_v12 = vpack.c.bf16 %v250_v11, %v248_v10  ;;  %v236_v13 = vld [vmem:[%s1077_s1] sm:$0xff]  ;;  %v237_v14 = vld [vmem:[%s1077_s1 + $0x8] sm:$0xff]  ;;  %v238_v15 = vld [vmem:[%s1077_s1 + $0x10] sm:$0xff]  ;;  %s517_s8 = sshll.u32 %s233_s7, 4  ;;  %s501_s24 = scalar_lea.sflag [#allocation4], %s976_s22  ;;  %s1029_s8 = int_to_ptr.vmem [resolvable:$true] %s517_s8 }
  0x3e   : > { %631 = vmatpush1.bf16.msra.mxu0 %v630_v8  ;;  %v239_v16 = vld [vmem:[%s1077_s1 + $0x18] sm:$0xff]  ;;  %v240_v17 = vld [vmem:[%s1077_s1 + $0x20] sm:$0xff]  ;;  %v241_v18 = vld [vmem:[%s1077_s1 + $0x28] sm:$0xff]  ;;  %s749_s25 = scalar_lea.vmem %s1029_s8, 64  ;;  %p1088_p9 = scmp.ne.s32.totalorder %s1084_s28, 0 }
  0x3f   : > { %633 = vmatprep.subr.bf16.mxu0 %v632_v9  ;;  %v242_v19 = vld [vmem:[%s1077_s1 + $0x30] sm:$0xff]  ;;  %v243_v20 = vld [vmem:[%s1077_s1 + $0x38] sm:$0xff]  ;;  %v407_v21 = vld [vmem:[%s1079_s3] sm:$0x3]  ;;  %p750_p8 = scmp.ne.s32.totalorder %s1029_s8, %s749_s25  ;;  %s838_s18 = smov [#allocation5]  }
  0x40   : > { %410 = vperm.xlu0 %718, %v407_v21   ;;  %v406_v63 = vld [vmem:[%s1078_s2] sm:$0x3]  ;;  %s753_s26 = sshll.u32 %s838_s18, 4  ;;  %s754_s26 = int_to_ptr.vmem [resolvable:$false] %s753_s26 }
  0x41   : > { %p751_p11 = pnand %p750_p8, %p1088_p9  ;;  %s755_s27 = scalar_lea.vmem %s754_s26, 128 }
  0x42   : > { %635 = vmatpush1.bf16.msra.mxu0 %v634_v12  ;;  %p756_p6 = scmp.lt.s32.totalorder %s1029_s8, %s754_s26  ;;  %p757_p13 = scmp.lt.s32.totalorder %s755_s27, %s749_s25 }
  0x43   : > { %p752_p0 = pneg %p751_p11 }
  0x44   : > { %p758_p2 = por %p757_p13, %p756_p6 }
  0x45   : > { %611 = vmatmul.mubr.msk.f32.vlgmr.msra.gmra.mrb[0].mxu0 %vm252_vm0, %v236_v13 }
  0x46   : > { %347 = vmatprep.mubr.f32.mxu0 %v836_v0  ;;  %p759_p5 = pnand %p758_p2, %p752_p0 }
  0x49   : > { %612 = vmatmul.mubr.msk.f32.gmra.mrb[2].mxu0 %vm252_vm0, %v237_v14 }
  0x4a   : > { %353 = vmatprep.mubr.f32.mxu0 %v836_v0 }
  0x4d   : > { %613 = vmatmul.mubr.msk.f32.gmra.mrb[4].mxu0 %vm252_vm0, %v238_v15 }
  0x4e   : > { %359 = vmatprep.mubr.f32.mxu0 %v836_v0 }
  0x51   : > { %614 = vmatmul.mubr.msk.f32.gmra.mrb[6].mxu0 %vm252_vm0, %v239_v16 }
  0x52   : > { %365 = vmatprep.mubr.f32.mxu0 %v836_v0 }
  0x55   : > { %615 = vmatmul.mubr.msk.f32.gmra.mrb[8].mxu0 %vm252_vm0, %v240_v17 }
  0x56   : > { %371 = vmatprep.mubr.f32.mxu0 %v836_v0 }
  0x59   : > { %616 = vmatmul.mubr.msk.f32.gmra.mrb[10].mxu0 %vm252_vm0, %v241_v18 }
  0x5a   : > { %377 = vmatprep.mubr.f32.mxu0 %v836_v0 }
  0x5d   : > { %617 = vmatmul.mubr.msk.f32.gmra.mrb[12].mxu0 %vm252_vm0, %v242_v19 }
  0x5e   : > { %383 = vmatprep.mubr.f32.mxu0 %v836_v0 }
  0x61   : > { %618 = vmatmul.mubr.msk.f32.gmra.mrb[14].mxu0 %vm252_vm0, %v243_v20 }
  0xbf   : > { %v411_v0 = vpop.permute.xlu0 %410 }
 0x118   : > { %v343_v23 = vpop.f32.mrb[0].mxu0 }
 0x119   : > { %v345_v24 = vpop.f32.mrb[1].mxu0  ;;  %v390_v26 = vmax.f32 %v343_v23, 0.0 }
 0x11a   : > { %v391_v29 = vmax.f32 %v345_v24, 0.0 }
 0x11c   : > { %v349_v25 = vpop.f32.mrb[2].mxu0 }
 0x11d   : > { %v392_v27 = vmax.f32 %v349_v25, 0.0  ;;  %v351_v28 = vpop.f32.mrb[3].mxu0 }
 0x11e   : > { %v393_v30 = vmax.f32 %v351_v28, 0.0 }
 0x11f   : > { %v638_v31 = vpack.c.bf16 %v392_v27, %v390_v26 }
 0x120   : > { %v355_v32 = vpop.f32.mrb[4].mxu0  ;;  %v636_v33 = vpack.c.bf16 %v393_v30, %v391_v29 }
 0x121   : > { %v357_v34 = vpop.f32.mrb[5].mxu0  ;;  %v394_v36 = vmax.f32 %v355_v32, 0.0 }
 0x122   : > { %637 = vmatprep.subr.bf16.mxu1 %v636_v33  ;;  %v395_v39 = vmax.f32 %v357_v34, 0.0 }
 0x123   : > { %639 = vmatpush1.bf16.msra.mxu1 %v638_v31 }
 0x124   : > { %v361_v35 = vpop.f32.mrb[6].mxu0 }
 0x125   : > { %v396_v37 = vmax.f32 %v361_v35, 0.0  ;;  %v363_v38 = vpop.f32.mrb[7].mxu0 }
 0x126   : > { %v397_v40 = vmax.f32 %v363_v38, 0.0 }
 0x127   : > { %v642_v41 = vpack.c.bf16 %v396_v37, %v394_v36 }
 0x128   : > { %v640_v42 = vpack.c.bf16 %v397_v40, %v395_v39  ;;  %v367_v43 = vpop.f32.mrb[8].mxu0 }
 0x129   : > { %v369_v44 = vpop.f32.mrb[9].mxu0  ;;  %v398_v46 = vmax.f32 %v367_v43, 0.0 }
 0x12a   : > { %641 = vmatprep.subr.bf16.mxu1 %v640_v42  ;;  %v399_v49 = vmax.f32 %v369_v44, 0.0 }
 0x12b   : > { %643 = vmatpush1.bf16.msra.mxu1 %v642_v41 }
 0x12c   : > { %v373_v45 = vpop.f32.mrb[10].mxu0 }
 0x12d   : > { %v400_v47 = vmax.f32 %v373_v45, 0.0  ;;  %v375_v48 = vpop.f32.mrb[11].mxu0 }
 0x12e   : > { %v401_v50 = vmax.f32 %v375_v48, 0.0 }
 0x12f   : > { %v646_v51 = vpack.c.bf16 %v400_v47, %v398_v46 }
 0x130   : > { %v644_v52 = vpack.c.bf16 %v401_v50, %v399_v49  ;;  %v379_v53 = vpop.f32.mrb[12].mxu0 }
 0x131   : > { %v381_v54 = vpop.f32.mrb[13].mxu0  ;;  %v402_v56 = vmax.f32 %v379_v53, 0.0 }
 0x132   : > { %645 = vmatprep.subr.bf16.mxu1 %v644_v52  ;;  %v403_v59 = vmax.f32 %v381_v54, 0.0 }
 0x133   : > { %647 = vmatpush1.bf16.msra.mxu1 %v646_v51 }
 0x134   : > { %v385_v55 = vpop.f32.mrb[14].mxu0 }
 0x135   : > { %v404_v57 = vmax.f32 %v385_v55, 0.0  ;;  %v387_v58 = vpop.f32.mrb[15].mxu0 }
 0x136   : > { %v405_v60 = vmax.f32 %v387_v58, 0.0 }
 0x137   : > { %v650_v61 = vpack.c.bf16 %v404_v57, %v402_v56 }
 0x138   : > { %v648_v62 = vpack.c.bf16 %v405_v60, %v403_v59 }
 0x13a   : > { %649 = vmatprep.subr.bf16.mxu1 %v648_v62 }
 0x13b   : > { %651 = vmatpush1.bf16.msra.mxu1 %v650_v61 }
 0x13e   : > { %619 = vmatmul.mubr.msk.f32.vlgmr.msra.gmra.mrb[0].mxu1 %vm413_vm1, %v406_v63 }
 0x211   : > { %v483_v1 = vpop.f32.mrb[0].mxu1 }
 0x212   : > { %v484_v2 = vadd.f32 %v483_v1, %v411_v0  ;;  %v485_v3 = vpop.f32.mrb[1].mxu1 }
 0x213   : > { %v486_v4 = vadd.f32 %v485_v3, %v411_v0 }
 0x215   : > { %v490_v5 = vcombine.low %v484_v2, %v486_v4 }
 0x217   : > { %620 = vst.sshfl [vmem:[%s233_s7] sm:$0x33 pattern:$0x76325410] %v490_v5 }
 0x218   : > { %762 = shalt.err (!%p759_p5)
}
 0x219   : > { %s763_s22 = scalar_lea.hbm %s1027_s21, 64  ;;  %s767_s13 = scalar_lea.hbm %s1080_s4, 128 }
 0x21a   : > { %p764_p4 = scmp.ne.s32.totalorder %s1027_s21, %s763_s22  ;;  %p768_p12 = scmp.lt.u32.totalorder %s1027_s21, %s1080_s4 }
 0x21b   : > { %p769_p1 = scmp.lt.u32.totalorder %s767_s13, %s763_s22  ;;  %p771_p8 = scmp.lt.u32.totalorder %s763_s22, %s1027_s21 }
 0x21c   : > { %p765_p7 = pnand %p764_p4, %p1088_p9 }
 0x21d   : > { %p770_p3 = por %p769_p1, %p768_p12 }
 0x21e   : > { %p766_p10 = pneg %p765_p7 }
 0x21f   : > { %p772_p11 = por %p771_p8, %p770_p3 }
 0x221   : > { %p773_p0 = pnand %p772_p11, %p766_p10 }
 0x223   : > { %776 = shalt.err (!%p773_p0)
}
 0x224   : > { %654 = dma.vmem_to_hbm [thread:$0]  (%p1088_p9), %s1029_s8, 64, %s1027_s21, %s501_s24  }
 0x225 PF: > { %s529_s5 = sand.u32 1, %s811_s15   ;;  %p1089_p6 = scmp.ne.s32.totalorder %s1085_s30, 0 }
 0x226   : > { %p1090_p13 = scmp.ge.s32.totalorder %s831_s20, 2  ;;  %s530_s7 = scalar_lea.sflag [#allocation4], %s529_s5 }
 0x228   : > { %p661_p2 = pnand %p1090_p13, %p1089_p6 }
 0x22a   : > { %806 = dma.done.wait (!%p661_p2), %s530_s7, 64  }
 0x22b   : > { %808 = vsyncadd (!%p661_p2), %s530_s7, 4294967232  ;;  %s20_s20 = sadd.s32 1, %s831_s20   ;;  %s1091_s15 = smov %s815_s16 }
 0x22c   : > { %p17_p5 = scmp.ge.s32.totalorder %s20_s20, 4   ;;  %s1092_s16 = smov %s819_s17 }
 0x22d   : > { %s1093_s17 = smov %s920_s29  ;;  %s1094_s18 = smov %s827_s19 }
 0x22e   : > { %s1095_s19 = smov %s1097_s23  ;;  %19 = sbr.rel (!%p17_p5) target bundleno = 6 (0x6), region = 81 }
 0x235   :  { %535 = vsyncpa [#allocation3], 1 }
 0x236   :  { %537 = vsyncpa [#allocation3 + $0x1], 1 }
 0x237   :  { %538 = vsyncpa [#allocation4], 1 }
 0x238   :  { %540 = vsyncpa [#allocation4 + $0x1], 1 }

</bundles_post_ra>
